<compile_context>
chip_gen: v7x
topology: tpu7x:2x2x1
jax: 0.10.0
libtpu: 0.0.40
codegen_flags: <defaults>
</compile_context>

<pallas_src>
import functools
import math

import jax
import jax.numpy as jnp
from jax.experimental import pallas as pl
from jax.experimental.pallas import tpu as pltpu


# ----------------------------- problem sizes ------------------------------
N_NODES = 64      # number of graph nodes
N_FEATS = 32      # dataset.num_features
HIDDEN = 32       # args.hidden
N_CLASSES = 8     # dataset.num_classes
K = 5             # args.K (Chebyshev order)
C_PAD = 128       # lane-dense padded class dimension
BATCH = 4         # number of feature matrices per forward call


# ------------------------- Chebyshev coefficients -------------------------
def cheby(i, x):
    """Chebyshev polynomial T_i(x) for scalar python float x."""
    if i == 0:
        return 1.0
    if i == 1:
        return x
    t0, t1 = 1.0, x
    for _ in range(2, i + 1):
        t0, t1 = t1, 2.0 * x * t1 - t0
    return t1


def chebnetii_coeffs(k, temp):
    """ChebNetII reweighting of relu(temp) -> coe (length K+1), pure Python."""
    coe_tmp = [max(float(t), 0.0) for t in temp]
    coe = []
    for i in range(k + 1):
        c = 0.0
        for j in range(k + 1):
            x_j = math.cos((k - j + 0.5) * math.pi / (k + 1))
            c += coe_tmp[j] * cheby(i, x_j)
        coe.append(2.0 * c / (k + 1))
    return coe


# --------------------------- Pallas kernels --------------------------------
def cheb_poly_kernel(p_ref, b2_ref, m_ref, mb_ref, *, coe, n_classes):
    """One-time setup kernel.

    Builds:
      M      = coe[0]/2 * I + sum_{i=1}^K coe[i] * T_i(P)         (bf16 out)
      M_bias = rowsum(M)[:, None] * b2_pad, padded lanes -> -1e30  (f32 out)

    coe is a tuple of Python floats closed over the kernel (compile-time
    constants); P is the fixed (N, N) propagation operator.
    """
    k = len(coe) - 1
    p = p_ref[...]
    n = p.shape[0]
    rows = jax.lax.broadcasted_iota(jnp.int32, (n, n), 0)
    cols = jax.lax.broadcasted_iota(jnp.int32, (n, n), 1)
    eye = jnp.where(rows == cols, 1.0, 0.0).astype(jnp.float32)

    t0, t1 = eye, p
    m = (0.5 * coe[0]) * t0 + coe[1] * t1           # coe[0]/2 folded at trace time
    for i in range(2, k + 1):                        # static python loop (K const)
        t2 = 2.0 * jnp.dot(p, t1, preferred_element_type=jnp.float32) - t0
        m = m + coe[i] * t2
        t0, t1 = t1, t2
    m_ref[...] = m.astype(m_ref.dtype)               # bf16 operand for the MXU

    # M @ (1_N b2) == rowsum(M)[:, None] * b2_pad ; padded classes get -1e30
    # so the per-forward kernel needs no masking at all.
    rs = jnp.sum(m, axis=1, keepdims=True)                       # (n, 1)
    mb = rs * b2_ref[...]                                        # (n, C_PAD)
    lane = jax.lax.broadcasted_iota(jnp.int32, mb.shape, 1)
    mb_ref[...] = jnp.where(lane < n_classes, mb, jnp.float32(-1e30))


def chebnet2_fwd_kernel(x_ref, w1_ref, b1_ref, w2_ref, m_ref, mb_ref, out_ref):
    """Per-sample kernel: 3 bf16 matmuls (f32 accumulate) + log_softmax.

    Reordered algebra:  out = (M @ relu(xW1 + b1)) @ W2_pad + M_bias
    Padded logits come pre-masked (-1e30) via M_bias; output is lane-dense.
    """
    # lin1 + relu   (dropout is identity in eval mode)
    h = jnp.dot(x_ref[0], w1_ref[...], preferred_element_type=jnp.float32)
    h = jnp.maximum(h + b1_ref[...], 0.0)

    # collapsed ChebNetII propagation on the *hidden* features (N,N)@(N,H)
    mh = jnp.dot(m_ref[...], h.astype(jnp.bfloat16),
                 preferred_element_type=jnp.float32)

    # lin2 on the propagated hidden state; M_bias carries M@b2 and the
    # -1e30 padding mask for lanes >= n_classes.
    logits = jnp.dot(mh.astype(jnp.bfloat16), w2_ref[...],
                     preferred_element_type=jnp.float32) + mb_ref[...]

    # numerically stable log_softmax over the class axis
    mx = jnp.max(logits, axis=1, keepdims=True)
    s = logits - mx
    lse = jnp.log(jnp.sum(jnp.exp(s), axis=1, keepdims=True))
    out_ref[0] = s - lse              # full (N, C_PAD) unmasked store (lane-dense)


# ------------------------------ wrappers ------------------------------------
_VMEM = pl.BlockSpec(memory_space=pltpu.MemorySpace.VMEM)


def build_prop_poly(p, b2_pad, coe):
    """One-time setup: collapsed Chebyshev operator M (bf16) and M_bias (f32)."""
    n = p.shape[0]
    c_pad = b2_pad.shape[1]
    m, m_bias = pl.pallas_call(
        functools.partial(cheb_poly_kernel,
                          coe=tuple(float(c) for c in coe),
                          n_classes=N_CLASSES),
        out_shape=(jax.ShapeDtypeStruct((n, n), jnp.bfloat16),
                   jax.ShapeDtypeStruct((n, c_pad), jnp.float32)),
        in_specs=[_VMEM, _VMEM],
        out_specs=(_VMEM, _VMEM),
        compiler_params=pltpu.CompilerParams(vmem_limit_bytes=32 * 1024 * 1024),
        cost_estimate=pl.CostEstimate(
            flops=int(2 * (len(coe) - 2) * n * n * n + n * n + n * c_pad),
            transcendentals=0,
            bytes_accessed=int(4 * (n * n + c_pad + n * c_pad) + 2 * n * n)),
    )(p, b2_pad)
    return m, m_bias


def chebnet2_forward(x, w1, b1, w2_pad, m, m_bias):
    """Batched forward: x is (B, N, F) bf16 -> (B, N, C_PAD) f32 log-softmax.

    Weights / M / M_bias index_maps return block (0, 0) so they stay
    VMEM-resident across the batch grid (no per-sample re-DMA). The output
    is left lane-dense; the caller slices to N_CLASSES at the final consumer.
    """
    bsz, n, f = x.shape
    h = w1.shape[1]
    c_pad = w2_pad.shape[1]

    flops = bsz * (2 * n * f * h + 2 * n * n * h + 2 * n * h * c_pad)
    bytes_accessed = (2 * (x.size + w1.size + w2_pad.size + m.size)
                      + 4 * (b1.size + m_bias.size + bsz * n * c_pad))

    return pl.pallas_call(
        chebnet2_fwd_kernel,
        out_shape=jax.ShapeDtypeStruct((bsz, n, c_pad), jnp.float32),
        grid=(bsz,),
        in_specs=[
            pl.BlockSpec((1, n, f), lambda b: (b, 0, 0)),      # x[b]
            pl.BlockSpec((f, h), lambda b: (0, 0)),            # W1 (resident)
            pl.BlockSpec((1, h), lambda b: (0, 0)),            # b1 (resident)
            pl.BlockSpec((h, c_pad), lambda b: (0, 0)),        # W2_pad (resident)
            pl.BlockSpec((n, n), lambda b: (0, 0)),            # M (resident)
            pl.BlockSpec((n, c_pad), lambda b: (0, 0)),        # M_bias (resident)
        ],
        out_specs=pl.BlockSpec((1, n, c_pad), lambda b: (b, 0, 0)),
        compiler_params=pltpu.CompilerParams(
            dimension_semantics=("parallel",),
            vmem_limit_bytes=32 * 1024 * 1024),
        cost_estimate=pl.CostEstimate(
            flops=int(flops),
            transcendentals=int(bsz * (n * c_pad + n)),
            bytes_accessed=int(bytes_accessed)),
    )(x, w1, b1, w2_pad, m, m_bias)


# ------------------------------ graph / glue -------------------------------
def build_edge_index(n):
    """Deterministic undirected graph: ring + a few chords."""
    src, dst = [], []
    for i in range(n):
        j = (i + 1) % n
        src += [i, j]
        dst += [j, i]
        k = (i + 7) % n  # chord
        src += [i, k]
        dst += [k, i]
    return jnp.array(src, dtype=jnp.int32), jnp.array(dst, dtype=jnp.int32)


def build_prop_matrix(row, col, n):
    """Dense P = -(D^{-1/2} A D^{-1/2}), i.e. L_sym - I (self loops filled -1)."""
    a = jnp.zeros((n, n), dtype=jnp.float32)
    a = a.at[row, col].add(1.0)
    deg = jnp.sum(a, axis=1)
    dinv = jnp.where(deg > 0.0, 1.0 / jnp.sqrt(deg), 0.0)
    return -(dinv[:, None] * a * dinv[None, :])


def init_linear(key, fan_in, fan_out):
    """Deterministic uniform(-1/sqrt(fan_in), 1/sqrt(fan_in)) like torch Linear."""
    kw, kb = jax.random.split(key)
    bound = 1.0 / math.sqrt(fan_in)
    w = jax.random.uniform(kw, (fan_in, fan_out), jnp.float32, -bound, bound)
    b = jax.random.uniform(kb, (1, fan_out), jnp.float32, -bound, bound)
    return w, b


def reference_forward(x, w1, b1, w2, b2, p, coe):
    """Pure-JAX f32 reference with the original serial Chebyshev recurrence."""
    h = jnp.maximum(x @ w1 + b1, 0.0)
    z = h @ w2 + b2
    tx0 = z
    tx1 = p @ z
    out = coe[0] / 2.0 * tx0 + coe[1] * tx1
    for i in range(2, K + 1):
        tx2 = 2.0 * (p @ tx1) - tx0
        out = out + coe[i] * tx2
        tx0, tx1 = tx1, tx2
    return jax.nn.log_softmax(out, axis=1)


if __name__ == "__main__":
    key = jax.random.PRNGKey(0)
    kx, k1, k2 = jax.random.split(key, 3)

    # batch of node-feature matrices (data.x per sample)
    x = jax.random.normal(kx, (BATCH, N_NODES, N_FEATS), dtype=jnp.float32)

    # parameters
    w1, b1 = init_linear(k1, N_FEATS, HIDDEN)
    w2, b2 = init_linear(k2, HIDDEN, N_CLASSES)

    # lane-dense padded lin2 weights (extra class columns are zero)
    w2_pad = jnp.zeros((HIDDEN, C_PAD), jnp.float32).at[:, :N_CLASSES].set(w2)
    b2_pad = jnp.zeros((1, C_PAD), jnp.float32).at[:, :N_CLASSES].set(b2)

    # ChebnetII_prop.temp after reset_parameters (Init=False) is all ones;
    # coe is a compile-time constant folded into the setup kernel.
    temp = [1.0] * (K + 1)
    coe = chebnetii_coeffs(K, temp)

    # graph / propagation operator (glue; dense for small N)
    row, col = build_edge_index(N_NODES)
    p = build_prop_matrix(row, col, N_NODES)

    # one-time setup: collapsed Chebyshev polynomial of P (+ folded bias/mask)
    m, m_bias = build_prop_poly(p, b2_pad, coe)
    m = jax.block_until_ready(m)

    # bf16 MXU operands (accumulation stays f32 inside the kernel)
    x_bf16 = x.astype(jnp.bfloat16)
    w1_bf16 = w1.astype(jnp.bfloat16)
    w2_pad_bf16 = w2_pad.astype(jnp.bfloat16)

    # per-forward kernel: lane-dense (B, N, 128) log-softmax
    out_pad = chebnet2_forward(x_bf16, w1_bf16, b1, w2_pad_bf16, m, m_bias)
    out_pad = jax.block_until_ready(out_pad)
    assert out_pad.shape == (BATCH, N_NODES, C_PAD)

    # final consumer: slice padded lanes off only here
    out = out_pad[..., :N_CLASSES]
    assert out.shape == (BATCH, N_NODES, N_CLASSES)
    assert bool(jnp.all(jnp.isfinite(out)))
    # log_softmax rows should sum to ~1 after exp
    assert bool(jnp.allclose(jnp.sum(jnp.exp(out), axis=-1), 1.0, atol=1e-3))

    # matches the original serial-recurrence semantics (f32 reference;
    # tolerance relaxed for bf16 MXU operands)
    coe_arr = jnp.array(coe, dtype=jnp.float32)
    for b in range(BATCH):
        ref = reference_forward(x[b], w1, b1, w2, b2, p, coe_arr)
        assert bool(jnp.allclose(out[b], ref, atol=5e-2, rtol=5e-2))

    print("KERNEL_OK")
</pallas_src>

<mosaic_0001>
module attributes {stable_mosaic.version = 11 : i64} {
  func.func @cheb_poly_kernel(%arg0: memref<64x64xf32, #tpu.memory_space<vmem>>, %arg1: memref<1x128xf32, #tpu.memory_space<vmem>>, %arg2: memref<64x64xbf16, #tpu.memory_space<vmem>>, %arg3: memref<64x128xf32, #tpu.memory_space<vmem>>) attributes {dimension_semantics = [], scalar_prefetch = 0 : i64, scratch_operands = 0 : i64, tpu.core_type = #tpu.core_type<tc>} {
    %c0 = arith.constant 0 : index
    %c0_0 = arith.constant 0 : index
    %0 = vector.load %arg0[%c0, %c0_0] : memref<64x64xf32, #tpu.memory_space<vmem>>, vector<64x64xf32>
    %1 = tpu.iota {dimensions = array<i32: 0>} : vector<64x64xi32>
    %2 = tpu.iota {dimensions = array<i32: 1>} : vector<64x64xi32>
    %3 = arith.cmpi eq, %1, %2 : vector<64x64xi32>
    %cst = arith.constant 1.000000e+00 : f32
    %cst_1 = arith.constant 0.000000e+00 : f32
    %4 = vector.broadcast %cst : f32 to vector<64x64xf32>
    %5 = vector.broadcast %cst_1 : f32 to vector<64x64xf32>
    %6 = arith.select %3, %4, %5 : vector<64x64xi1>, vector<64x64xf32>
    %cst_2 = arith.constant 1.000000e+00 : f32
    %7 = vector.broadcast %cst_2 : f32 to vector<64x64xf32>
    %8 = arith.mulf %7, %6 : vector<64x64xf32>
    %cst_3 = arith.constant 7.40148705E-17 : f32
    %9 = vector.broadcast %cst_3 : f32 to vector<64x64xf32>
    %10 = arith.mulf %9, %0 : vector<64x64xf32>
    %11 = arith.addf %8, %10 : vector<64x64xf32>
    %cst_4 = arith.constant dense<0.000000e+00> : vector<64x64xf32>
    %12 = tpu.matmul %0, %0, %cst_4 {dimension_numbers = #tpu.dot_dimension_numbers<[1], [0], [0], [1], [0, 0, 1, 1], [], []>} : vector<64x64xf32>, vector<64x64xf32>, vector<64x64xf32> -> vector<64x64xf32>
    %cst_5 = arith.constant 2.000000e+00 : f32
    %13 = vector.broadcast %cst_5 : f32 to vector<64x64xf32>
    %14 = arith.mulf %13, %12 : vector<64x64xf32>
    %15 = arith.subf %14, %6 : vector<64x64xf32>
    %cst_6 = arith.constant -1.11022302E-16 : f32
    %16 = vector.broadcast %cst_6 : f32 to vector<64x64xf32>
    %17 = arith.mulf %16, %15 : vector<64x64xf32>
    %18 = arith.addf %11, %17 : vector<64x64xf32>
    %cst_7 = arith.constant dense<0.000000e+00> : vector<64x64xf32>
    %19 = tpu.matmul %0, %15, %cst_7 {dimension_numbers = #tpu.dot_dimension_numbers<[1], [0], [0], [1], [0, 0, 1, 1], [], []>} : vector<64x64xf32>, vector<64x64xf32>, vector<64x64xf32> -> vector<64x64xf32>
    %cst_8 = arith.constant 2.000000e+00 : f32
    %20 = vector.broadcast %cst_8 : f32 to vector<64x64xf32>
    %21 = arith.mulf %20, %19 : vector<64x64xf32>
    %22 = arith.subf %21, %0 : vector<64x64xf32>
    %cst_9 = arith.constant 3.70074333E-16 : f32
    %23 = vector.broadcast %cst_9 : f32 to vector<64x64xf32>
    %24 = arith.mulf %23, %22 : vector<64x64xf32>
    %25 = arith.addf %18, %24 : vector<64x64xf32>
    %cst_10 = arith.constant dense<0.000000e+00> : vector<64x64xf32>
    %26 = tpu.matmul %0, %22, %cst_10 {dimension_numbers = #tpu.dot_dimension_numbers<[1], [0], [0], [1], [0, 0, 1, 1], [], []>} : vector<64x64xf32>, vector<64x64xf32>, vector<64x64xf32> -> vector<64x64xf32>
    %cst_11 = arith.constant 2.000000e+00 : f32
    %27 = vector.broadcast %cst_11 : f32 to vector<64x64xf32>
    %28 = arith.mulf %27, %26 : vector<64x64xf32>
    %29 = arith.subf %28, %15 : vector<64x64xf32>
    %cst_12 = arith.constant 7.40148705E-17 : f32
    %30 = vector.broadcast %cst_12 : f32 to vector<64x64xf32>
    %31 = arith.mulf %30, %29 : vector<64x64xf32>
    %32 = arith.addf %25, %31 : vector<64x64xf32>
    %cst_13 = arith.constant dense<0.000000e+00> : vector<64x64xf32>
    %33 = tpu.matmul %0, %29, %cst_13 {dimension_numbers = #tpu.dot_dimension_numbers<[1], [0], [0], [1], [0, 0, 1, 1], [], []>} : vector<64x64xf32>, vector<64x64xf32>, vector<64x64xf32> -> vector<64x64xf32>
    %cst_14 = arith.constant 2.000000e+00 : f32
    %34 = vector.broadcast %cst_14 : f32 to vector<64x64xf32>
    %35 = arith.mulf %34, %33 : vector<64x64xf32>
    %36 = arith.subf %35, %22 : vector<64x64xf32>
    %cst_15 = arith.constant 4.81096662E-16 : f32
    %37 = vector.broadcast %cst_15 : f32 to vector<64x64xf32>
    %38 = arith.mulf %37, %36 : vector<64x64xf32>
    %39 = arith.addf %32, %38 : vector<64x64xf32>
    %40 = arith.truncf %39 : vector<64x64xf32> to vector<64x64xbf16>
    %c0_16 = arith.constant 0 : index
    %c0_17 = arith.constant 0 : index
    %41 = vector.load %arg2[%c0_16, %c0_17] : memref<64x64xbf16, #tpu.memory_space<vmem>>, vector<64x64xbf16>
    tpu.vector_store %arg2[%c0_16, %c0_17], %40 {strides = array<i32>} : memref<64x64xbf16, #tpu.memory_space<vmem>>, vector<64x64xbf16>,
    %cst_18 = arith.constant dense<0.000000e+00> : vector<64xf32>
    %42 = vector.multi_reduction <add>, %39, %cst_18 [1] : vector<64x64xf32> to vector<64xf32>
    %43 = vector.shape_cast %42 : vector<64xf32> to vector<64x1xf32>
    %c0_19 = arith.constant 0 : index
    %c0_20 = arith.constant 0 : index
    %44 = vector.load %arg1[%c0_19, %c0_20] : memref<1x128xf32, #tpu.memory_space<vmem>>, vector<1x128xf32>
    %45 = vector.broadcast %43 : vector<64x1xf32> to vector<64x128xf32>
    %46 = vector.broadcast %44 : vector<1x128xf32> to vector<64x128xf32>
    %47 = arith.mulf %45, %46 : vector<64x128xf32>
    %48 = tpu.iota {dimensions = array<i32: 1>} : vector<64x128xi32>
    %c8_i32 = arith.constant 8 : i32
    %49 = vector.broadcast %c8_i32 : i32 to vector<64x128xi32>
    %50 = arith.cmpi slt, %48, %49 : vector<64x128xi32>
    %cst_21 = arith.constant -1.000000e+30 : f32
    %51 = vector.broadcast %cst_21 : f32 to vector<64x128xf32>
    %52 = arith.select %50, %47, %51 : vector<64x128xi1>, vector<64x128xf32>
    %c0_22 = arith.constant 0 : index
    %c0_23 = arith.constant 0 : index
    %53 = vector.load %arg3[%c0_22, %c0_23] : memref<64x128xf32, #tpu.memory_space<vmem>>, vector<64x128xf32>
    tpu.vector_store %arg3[%c0_22, %c0_23], %52 {strides = array<i32>} : memref<64x128xf32, #tpu.memory_space<vmem>>, vector<64x128xf32>,
    return
  }
}

</mosaic_0001>

<bundles_post_ra>
// kernel: tpu_custom_call.1
= control target key start
LH: loop header
LB: loop body
LE: loop exit
PB: predicated region body
PF: predicated region fallthrough
CT: control target
= control target key end

     0   :  { %9 = vsyncpa [#allocation3], 0  ;;  %s1522_s0 = inlined_call_operand.hbm [shape: f32[64,64], index: 0, kind: input, shape index: {}]   ;;  %s1523_s1 = inlined_call_operand.vmem [shape: f32[1,128], index: 1, kind: input, shape index: {}]   ;;  %s1524_s2 = inlined_call_operand.hbm [shape: bf16[64,64], index: 2, kind: output, shape index: {0}]   ;;  %s1525_s3 = inlined_call_operand.hbm [shape: f32[64,128], index: 3, kind: output, shape index: {1}]  }
   0x1   :  { %10 = vsyncpa [#allocation4], 0 }
   0x2   :  { %11 = vsyncpa [#allocation7], 0  ;;  %s1152_s12 = smov [#allocation2]   ;;  %s1080_s16 = scalar_lea.hbm %s1522_s0, 1024 }
   0x3   :  { %s17_s13 = sshll.u32 %s1152_s12, 4  ;;  %p1081_p0 = scmp.ne.s32.totalorder %s1522_s0, %s1080_s16  ;;  %s18_s13 = int_to_ptr.vmem [resolvable:$true] %s17_s13 }
   0x4   :  { %p1084_p1 = scmp.lt.u32.totalorder %s1080_s16, %s1522_s0 }
   0x6   :  { %p1086_p2 = pnand %p1084_p1, %p1081_p0 }
   0x8   :  { %1089 = shalt.err (!%p1086_p2)
}
   0x9   :  { %s1090_s21 = scalar_lea.vmem %s18_s13, 1024  ;;  %p1095_p4 = scmp.lt.s32.totalorder %s18_s13, %s18_s13 }
   0xa   :  { %p1091_p3 = scmp.ne.s32.totalorder %s18_s13, %s1090_s21  ;;  %p1096_p5 = scmp.lt.s32.totalorder %s1090_s21, %s1090_s21 }
   0xc   :  { %p1097_p6 = por %p1096_p5, %p1095_p4 }
   0xe   :  { %p1098_p7 = pnand %p1097_p6, %p1091_p3 }
  0x10   :  { %1101 = shalt.err (!%p1098_p7)
}
  0x11   :  { %s1153_s22 = smov 128   ;;  %s1154_s23 = smov 8  }
  0x12   :  { %23 = dma.hbm_to_vmem [thread:$0]  %s1522_s0, 1024, %s18_s13, [#allocation3], %s1153_s22, %s1153_s22, %s1154_s23  }
  0x13   :  { %1146 = dma.done.wait [#allocation3], 1024  }
  0x14   :  { %1147 = vsyncadd [#allocation3], 4294966272  ;;  %vm80_vm0 = vcmask 523264   ;;  %v1195_v0 = vld [vmem:[#allocation2] sm:$0xff]  ;;  %v1197_v1 = vld [vmem:[#allocation2 + $0x8] sm:$0xff]  ;;  %v37_v12 = vlaneseq  ;;  %v1155_v18 = vmov 0.0  }
  0x15   :  { %v1199_v2 = vld [vmem:[#allocation2 + $0x10] sm:$0xff]  ;;  %v1008_v3 = vpack.c.bf16 %v1197_v1, %v1195_v0  ;;  %v1203_v4 = vld [vmem:[#allocation2 + $0x18] sm:$0xff]  ;;  %912 = vmatprep.mubr.msk.f32.mxu0 %vm80_vm0, %v1195_v0  ;;  %940 = vmatprep.mubr.msk.f32.mxu1 %vm80_vm0, %v1195_v0  ;;  %v1211_v6 = vld [vmem:[#allocation2 + $0x20] sm:$0xff]  ;;  %vm685_vm9 = vcmask 519168   ;;  %s1156_s0 = smov [#allocation5]  }
  0x16   :  { %v1012_v5 = vpack.c.bf16 %v1203_v4, %v1199_v2  ;;  %v1213_v7 = vld [vmem:[#allocation2 + $0x28] sm:$0xff]  ;;  %v1217_v9 = vld [vmem:[#allocation2 + $0x30] sm:$0xff]  ;;  %v1219_v10 = vld [vmem:[#allocation2 + $0x38] sm:$0xff]  ;;  %v38_v13 = vshrl.u32 %v37_v12, 7  ;;  %v1239_v15 = vand.u32 127, %v37_v12  ;;  %s755_s26 = sshll.u32 %s1156_s0, 4  ;;  %s756_s26 = int_to_ptr.vmem [resolvable:$true] %s755_s26 }
  0x17   :  { %1009 = vmatprep.subr.bf16.mxu0 %v1008_v3  ;;  %v1016_v8 = vpack.c.bf16 %v1213_v7, %v1211_v6  ;;  %v1020_v11 = vpack.c.bf16 %v1219_v10, %v1217_v9  ;;  %s1102_s27 = scalar_lea.vmem %s756_s26, 512  ;;  %p1107_p9 = scmp.lt.s32.totalorder %s756_s26, %s756_s26 }
  0x18   :  { %1011 = vmatpush3.bf16.msra.mxu0 %v1008_v3  ;;  %v39_v14 = vadd.s32 8, %v38_v13  ;;  %v41_v16 = vadd.s32 24, %v38_v13  ;;  %vm48_vm2 = vcmp.eq.s32.totalorder %v38_v13, %v1239_v15  ;;  %v40_v17 = vadd.s32 16, %v38_v13  ;;  %p1103_p8 = scmp.ne.s32.totalorder %s756_s26, %s1102_s27  ;;  %p1108_p10 = scmp.lt.s32.totalorder %s1102_s27, %s1102_s27 }
  0x19   :  { %1013 = vmatprep.subr.bf16.mxu0 %v1012_v5  ;;  %v1245_v22 = vsel %vm48_vm2, 1.0, %v1155_v18  ;;  %v43_v24 = vadd.s32 40, %v38_v13  ;;  %v42_v26 = vadd.s32 32, %v38_v13  ;;  %v45_v34 = vadd.s32 56, %v38_v13 }
  0x1a   :  { %vm49_vm1 = vcmp.eq.s32.totalorder %v39_v14, %v1239_v15  ;;  %vm51_vm3 = vcmp.eq.s32.totalorder %v41_v16, %v1239_v15  ;;  %vm50_vm4 = vcmp.eq.s32.totalorder %v40_v17, %v1239_v15  ;;  %v44_v37 = vadd.s32 48, %v38_v13  ;;  %p1109_p11 = por %p1108_p10, %p1107_p9 }
  0x1b   :  { %v1243_v19 = vsel %vm49_vm1, 1.0, %v1155_v18  ;;  %v1255_v29 = vsel %vm51_vm3, 1.0, %v1155_v18  ;;  %v1257_v32 = vsel %vm50_vm4, 1.0, %v1155_v18  ;;  %vm53_vm5 = vcmp.eq.s32.totalorder %v43_v24, %v1239_v15 }
  0x1c   :  { %1015 = vmatpush3.bf16.msra.mxu0 %v1012_v5  ;;  %vm52_vm6 = vcmp.eq.s32.totalorder %v42_v26, %v1239_v15  ;;  %v1269_v40 = vsel %vm53_vm5, 1.0, %v1155_v18  ;;  %vm55_vm7 = vcmp.eq.s32.totalorder %v45_v34, %v1239_v15  ;;  %vm54_vm8 = vcmp.eq.s32.totalorder %v44_v37, %v1239_v15  ;;  %p1110_p12 = pnand %p1109_p11, %p1103_p8 }
  0x1d   :  { %1017 = vmatprep.subr.bf16.mxu0 %v1016_v8  ;;  %v1271_v43 = vsel %vm52_vm6, 1.0, %v1155_v18  ;;  %v1283_v49 = vsel %vm55_vm7, 1.0, %v1155_v18  ;;  %v1285_v52 = vsel %vm54_vm8, 1.0, %v1155_v18 }
  0x20   :  { %1019 = vmatpush3.bf16.msra.mxu0 %v1016_v8 }
  0x21   :  { %1021 = vmatprep.subr.bf16.mxu0 %v1020_v11 }
  0x24   :  { %1023 = vmatpush3.bf16.msra.mxu0 %v1020_v11 }
  0x27   :  { %913 = vmatmul.mubr.msk.f32.vlgmr.msra.gmra.mrb[0].mxu0 %vm80_vm0, %v1197_v1 }
  0x28   :  { %915 = vmatprep.mubr.msk.f32.mxu0 %vm80_vm0, %v1199_v2 }
  0x2b   :  { %916 = vmatmul.mubr.msk.f32.gmra.mrb[2].mxu0 %vm80_vm0, %v1203_v4 }
  0x2c   :  { %918 = vmatprep.mubr.msk.f32.mxu0 %vm80_vm0, %v1211_v6 }
  0x2f   :  { %919 = vmatmul.mubr.msk.f32.gmra.mrb[4].mxu0 %vm80_vm0, %v1213_v7 }
  0x30   :  { %921 = vmatprep.mubr.msk.f32.mxu0 %vm80_vm0, %v1217_v9 }
  0x33   :  { %922 = vmatmul.mubr.msk.f32.gmra.mrb[6].mxu0 %vm80_vm0, %v1219_v10 }
  0x34   :  { %968 = vmatprep.mubr.msk.f32.mxu0 %vm80_vm0, %v1195_v0 }
  0xfa   :  { %v914_v20 = vpop.f32.mrb[0].mxu0 }
  0xfb   :  { %v211_v21 = vmul.f32 2.0, %v914_v20  ;;  %v171_v23 = vpop.f32.mrb[1].mxu0 }
  0xfc   :  { %v210_v25 = vmul.f32 2.0, %v171_v23 }
  0xfd   :  { %v1250_v27 = vsub.f32 %v211_v21, %v1243_v19 }
  0xfe   :  { %v1253_v28 = vsub.f32 %v210_v25, %v1245_v22  ;;  %v917_v30 = vpop.f32.mrb[2].mxu0 }
  0xff   :  { %v213_v31 = vmul.f32 2.0, %v917_v30  ;;  %v181_v33 = vpop.f32.mrb[3].mxu0 }
 0x100   :  { %v212_v35 = vmul.f32 2.0, %v181_v33  ;;  %v1024_v36 = vpack.c.bf16 %v1250_v27, %v1253_v28 }
 0x101   :  { %v1264_v38 = vsub.f32 %v213_v31, %v1255_v29 }
 0x102   :  { %v1267_v39 = vsub.f32 %v212_v35, %v1257_v32  ;;  %v920_v41 = vpop.f32.mrb[4].mxu0  ;;  %1025 = vmatprep.subr.bf16.mxu1 %v1024_v36 }
 0x103   :  { %v215_v42 = vmul.f32 2.0, %v920_v41  ;;  %v191_v44 = vpop.f32.mrb[5].mxu0  ;;  %1027 = vmatpush3.bf16.msra.mxu1 %v1024_v36 }
 0x104   :  { %v214_v45 = vmul.f32 2.0, %v191_v44  ;;  %v1028_v46 = vpack.c.bf16 %v1264_v38, %v1267_v39 }
 0x105   :  { %v1278_v47 = vsub.f32 %v215_v42, %v1269_v40 }
 0x106   :  { %v1281_v48 = vsub.f32 %v214_v45, %v1271_v43  ;;  %v923_v50 = vpop.f32.mrb[6].mxu0  ;;  %1029 = vmatprep.subr.bf16.mxu1 %v1028_v46 }
 0x107   :  { %v217_v51 = vmul.f32 2.0, %v923_v50  ;;  %v201_v53 = vpop.f32.mrb[7].mxu0  ;;  %1031 = vmatpush3.bf16.msra.mxu1 %v1028_v46 }
 0x108   :  { %v216_v54 = vmul.f32 2.0, %v201_v53  ;;  %v1032_v55 = vpack.c.bf16 %v1278_v47, %v1281_v48 }
 0x109   :  { %v1290_v56 = vsub.f32 %v217_v51, %v1283_v49 }
 0x10a   :  { %v1293_v57 = vsub.f32 %v216_v54, %v1285_v52  ;;  %1033 = vmatprep.subr.bf16.mxu1 %v1032_v55 }
 0x10b   :  { %1035 = vmatpush3.bf16.msra.mxu1 %v1032_v55 }
 0x10c   :  { %v1036_v58 = vpack.c.bf16 %v1290_v56, %v1293_v57 }
 0x10e   :  { %1037 = vmatprep.subr.bf16.mxu1 %v1036_v58 }
 0x10f   :  { %1039 = vmatpush3.bf16.msra.mxu1 %v1036_v58 }
 0x112   :  { %941 = vmatmul.mubr.msk.f32.vlgmr.msra.gmra.mrb[0].mxu1 %vm80_vm0, %v1197_v1 }
 0x113   :  { %943 = vmatprep.mubr.msk.f32.mxu1 %vm80_vm0, %v1199_v2 }
 0x116   :  { %944 = vmatmul.mubr.msk.f32.gmra.mrb[2].mxu1 %vm80_vm0, %v1203_v4 }
 0x117   :  { %946 = vmatprep.mubr.msk.f32.mxu1 %vm80_vm0, %v1211_v6 }
 0x11a   :  { %947 = vmatmul.mubr.msk.f32.gmra.mrb[4].mxu1 %vm80_vm0, %v1213_v7 }
 0x11b   :  { %949 = vmatprep.mubr.msk.f32.mxu1 %vm80_vm0, %v1217_v9 }
 0x11e   :  { %950 = vmatmul.mubr.msk.f32.gmra.mrb[6].mxu1 %vm80_vm0, %v1219_v10 }
 0x11f   :  { %996 = vmatprep.mubr.msk.f32.mxu1 %vm80_vm0, %v1195_v0 }
 0x1e5   :  { %v942_v59 = vpop.f32.mrb[0].mxu1 }
 0x1e6   :  { %v348_v60 = vmul.f32 2.0, %v942_v59  ;;  %v308_v61 = vpop.f32.mrb[1].mxu1 }
 0x1e7   :  { %v347_v62 = vmul.f32 2.0, %v308_v61 }
 0x1e8   :  { %v1314_v63 = vsub.f32 %v348_v60, %v1197_v1 }
 0x1e9   :  { %v1317_v3 = vsub.f32 %v347_v62, %v1195_v0  ;;  %v945_v5 = vpop.f32.mrb[2].mxu1 }
 0x1ea   :  { %v350_v8 = vmul.f32 2.0, %v945_v5  ;;  %v318_v11 = vpop.f32.mrb[3].mxu1 }
 0x1eb   :  { %v349_v12 = vmul.f32 2.0, %v318_v11  ;;  %v1040_v13 = vpack.c.bf16 %v1314_v63, %v1317_v3 }
 0x1ec   :  { %v1322_v14 = vsub.f32 %v350_v8, %v1203_v4 }
 0x1ed   :  { %v1325_v16 = vsub.f32 %v349_v12, %v1199_v2  ;;  %v948_v17 = vpop.f32.mrb[4].mxu1  ;;  %1041 = vmatprep.subr.bf16.mxu0 %v1040_v13 }
 0x1ee   :  { %v352_v18 = vmul.f32 2.0, %v948_v17  ;;  %v328_v20 = vpop.f32.mrb[5].mxu1  ;;  %1043 = vmatpush3.bf16.msra.mxu0 %v1040_v13 }
 0x1ef   :  { %v351_v21 = vmul.f32 2.0, %v328_v20  ;;  %v1044_v23 = vpack.c.bf16 %v1322_v14, %v1325_v16 }
 0x1f0   :  { %v1330_v24 = vsub.f32 %v352_v18, %v1213_v7 }
 0x1f1   :  { %v1333_v25 = vsub.f32 %v351_v21, %v1211_v6  ;;  %v951_v26 = vpop.f32.mrb[6].mxu1  ;;  %1045 = vmatprep.subr.bf16.mxu0 %v1044_v23 }
 0x1f2   :  { %v354_v30 = vmul.f32 2.0, %v951_v26  ;;  %v338_v31 = vpop.f32.mrb[7].mxu1  ;;  %1047 = vmatpush3.bf16.msra.mxu0 %v1044_v23 }
 0x1f3   :  { %v353_v33 = vmul.f32 2.0, %v338_v31  ;;  %v1048_v34 = vpack.c.bf16 %v1330_v24, %v1333_v25 }
 0x1f4   :  { %v1338_v35 = vsub.f32 %v354_v30, %v1219_v10 }
 0x1f5   :  { %v1341_v36 = vsub.f32 %v353_v33, %v1217_v9  ;;  %1049 = vmatprep.subr.bf16.mxu0 %v1048_v34  ;;  %v65_v33 = vmul.f32 7.401487e-17, %v1197_v1 }
 0x1f6   :  { %1051 = vmatpush3.bf16.msra.mxu0 %v1048_v34  ;;  %v64_v34 = vmul.f32 7.401487e-17, %v1195_v0  ;;  %v226_v0 = vmul.f32 -1.110223e-16, %v1253_v28 }
 0x1f7   :  { %v1052_v37 = vpack.c.bf16 %v1338_v35, %v1341_v36 }
 0x1f9   :  { %1053 = vmatprep.subr.bf16.mxu0 %v1052_v37 }
 0x1fa   :  { %1055 = vmatpush3.bf16.msra.mxu0 %v1052_v37  ;;  %v67_v37 = vmul.f32 7.401487e-17, %v1203_v4 }
 0x1fd   :  { %969 = vmatmul.mubr.msk.f32.vlgmr.msra.gmra.mrb[8].mxu0 %vm80_vm0, %v1197_v1 }
 0x1fe   :  { %971 = vmatprep.mubr.msk.f32.mxu0 %vm80_vm0, %v1199_v2 }
 0x201   :  { %972 = vmatmul.mubr.msk.f32.gmra.mrb[10].mxu0 %vm80_vm0, %v1203_v4 }
 0x202   :  { %974 = vmatprep.mubr.msk.f32.mxu0 %vm80_vm0, %v1211_v6 }
 0x205   :  { %975 = vmatmul.mubr.msk.f32.gmra.mrb[12].mxu0 %vm80_vm0, %v1213_v7 }
 0x206   :  { %977 = vmatprep.mubr.msk.f32.mxu0 %vm80_vm0, %v1217_v9 }
 0x209   :  { %978 = vmatmul.mubr.msk.f32.gmra.mrb[14].mxu0 %vm80_vm0, %v1219_v10 }
 0x2d0   :  { %v970_v41 = vpop.f32.mrb[8].mxu0 }
 0x2d1   :  { %v485_v42 = vmul.f32 2.0, %v970_v41  ;;  %v445_v44 = vpop.f32.mrb[9].mxu0  ;;  %v66_v41 = vmul.f32 7.401487e-17, %v1199_v2 }
 0x2d2   :  { %v484_v45 = vmul.f32 2.0, %v445_v44  ;;  %v68_v44 = vmul.f32 7.401487e-17, %v1211_v6 }
 0x2d3   :  { %v1360_v46 = vsub.f32 %v485_v42, %v1250_v27  ;;  %v69_v42 = vmul.f32 7.401487e-17, %v1213_v7 }
 0x2d4   :  { %v1363_v50 = vsub.f32 %v484_v45, %v1253_v28  ;;  %v973_v51 = vpop.f32.mrb[10].mxu0  ;;  %v71_v45 = vmul.f32 7.401487e-17, %v1219_v10  ;;  %v233_v28 = vmul.f32 -1.110223e-16, %v1290_v56 }
 0x2d5   :  { %v487_v53 = vmul.f32 2.0, %v973_v51  ;;  %v455_v54 = vpop.f32.mrb[11].mxu0  ;;  %v70_v51 = vmul.f32 7.401487e-17, %v1217_v9 }
 0x2d6   :  { %v486_v55 = vmul.f32 2.0, %v455_v54  ;;  %v1056_v58 = vpack.c.bf16 %v1360_v46, %v1363_v50  ;;  %v227_v54 = vmul.f32 -1.110223e-16, %v1250_v27  ;;  %v230_v27 = vmul.f32 -1.110223e-16, %v1281_v48 }
 0x2d7   :  { %v1368_v59 = vsub.f32 %v487_v53, %v1264_v38  ;;  %v73_v53 = vadd.f32 %v65_v33, %v1243_v19  ;;  %v76_v19 = vadd.f32 %v68_v44, %v1271_v43  ;;  %v365_v43 = vmul.f32 3.7007433e-16, %v1325_v16 }
 0x2d8   :  { %v1371_v60 = vsub.f32 %v486_v55, %v1267_v39  ;;  %v976_v61 = vpop.f32.mrb[12].mxu0  ;;  %1057 = vmatprep.subr.bf16.mxu1 %v1056_v58 }
 0x2d9   :  { %v489_v62 = vmul.f32 2.0, %v976_v61  ;;  %v465_v5 = vpop.f32.mrb[13].mxu0  ;;  %1059 = vmatpush3.bf16.msra.mxu1 %v1056_v58  ;;  %v235_v55 = vadd.f32 %v227_v54, %v73_v53 }
 0x2da   :  { %v488_v8 = vmul.f32 2.0, %v465_v5  ;;  %v1060_v11 = vpack.c.bf16 %v1368_v59, %v1371_v60 }
 0x2db   :  { %v1376_v12 = vsub.f32 %v489_v62, %v1278_v47 }
 0x2dc   :  { %v1379_v13 = vsub.f32 %v488_v8, %v1281_v48  ;;  %v979_v17 = vpop.f32.mrb[14].mxu0  ;;  %1061 = vmatprep.subr.bf16.mxu1 %v1060_v11  ;;  %v368_v48 = vmul.f32 3.7007433e-16, %v1330_v24  ;;  %v501_v8 = vmul.f32 7.401487e-17, %v1360_v46 }
 0x2dd   :  { %v491_v18 = vmul.f32 2.0, %v979_v17  ;;  %v475_v20 = vpop.f32.mrb[15].mxu0  ;;  %1063 = vmatpush3.bf16.msra.mxu1 %v1060_v11 }
 0x2de   :  { %v490_v21 = vmul.f32 2.0, %v475_v20  ;;  %v1064_v23 = vpack.c.bf16 %v1376_v12, %v1379_v13 }
 0x2df   :  { %v1384_v26 = vsub.f32 %v491_v18, %v1290_v56  ;;  %v238_v56 = vadd.f32 %v230_v27, %v76_v19  ;;  %v500_v18 = vmul.f32 7.401487e-17, %v1363_v50 }
 0x2e0   :  { %v1387_v30 = vsub.f32 %v490_v21, %v1293_v57  ;;  %1065 = vmatprep.subr.bf16.mxu1 %v1064_v23 }
 0x2e1   :  { %1067 = vmatpush3.bf16.msra.mxu1 %v1064_v23 }
 0x2e2   :  { %v1068_v31 = vpack.c.bf16 %v1384_v26, %v1387_v30 }
 0x2e4   :  { %1069 = vmatprep.subr.bf16.mxu1 %v1068_v31 }
 0x2e5   :  { %1071 = vmatpush3.bf16.msra.mxu1 %v1068_v31 }
 0x2e8   :  { %997 = vmatmul.mubr.msk.f32.vlgmr.msra.gmra.mrb[8].mxu1 %vm80_vm0, %v1197_v1  ;;  %v72_v1 = vadd.f32 %v64_v34, %v1245_v22  ;;  %v79_v22 = vadd.f32 %v71_v45, %v1283_v49 }
 0x2e9   :  { %999 = vmatprep.mubr.msk.f32.mxu1 %vm80_vm0, %v1199_v2  ;;  %v229_v2 = vmul.f32 -1.110223e-16, %v1264_v38  ;;  %v232_v38 = vmul.f32 -1.110223e-16, %v1293_v57 }
 0x2ea   :  { %v1435_v57 = vadd.f32 %v233_v28, %v79_v22 }
 0x2ec   :  { %1000 = vmatmul.mubr.msk.f32.gmra.mrb[10].mxu1 %vm80_vm0, %v1203_v4  ;;  %v75_v4 = vadd.f32 %v67_v37, %v1255_v29  ;;  %v78_v29 = vadd.f32 %v70_v51, %v1285_v52  ;;  %v367_v52 = vmul.f32 3.7007433e-16, %v1333_v25  ;;  %v369_v51 = vmul.f32 3.7007433e-16, %v1341_v36 }
 0x2ed   :  { %1002 = vmatprep.mubr.msk.f32.mxu1 %vm80_vm0, %v1211_v6  ;;  %v77_v6 = vadd.f32 %v69_v42, %v1269_v40  ;;  %v364_v40 = vmul.f32 3.7007433e-16, %v1314_v63  ;;  %v503_v42 = vmul.f32 7.401487e-17, %v1368_v59 }
 0x2ee   :  { %v237_v58 = vadd.f32 %v229_v2, %v75_v4  ;;  %v1437_v5 = vadd.f32 %v232_v38, %v78_v29  ;;  %v375_v46 = vadd.f32 %v367_v52, %v238_v56 }
 0x2ef   :  { %v372_v21 = vadd.f32 %v364_v40, %v235_v55 }
 0x2f0   :  { %1003 = vmatmul.mubr.msk.f32.gmra.mrb[12].mxu1 %vm80_vm0, %v1213_v7  ;;  %v74_v7 = vadd.f32 %v66_v41, %v1257_v32  ;;  %v234_v32 = vadd.f32 %v226_v0, %v72_v1  ;;  %v370_v41 = vmul.f32 3.7007433e-16, %v1338_v35  ;;  %v502_v0 = vmul.f32 7.401487e-17, %v1371_v60 }
 0x2f1   :  { %1005 = vmatprep.mubr.msk.f32.mxu1 %vm80_vm0, %v1217_v9  ;;  %v231_v9 = vmul.f32 -1.110223e-16, %v1278_v47  ;;  %v366_v47 = vmul.f32 3.7007433e-16, %v1322_v14  ;;  %v509_v1 = vadd.f32 %v501_v8, %v372_v21  ;;  %v506_v8 = vmul.f32 7.401487e-17, %v1387_v30 }
 0x2f3   :  { %v239_v61 = vadd.f32 %v231_v9, %v77_v6  ;;  %v374_v33 = vadd.f32 %v366_v47, %v237_v58  ;;  %v504_v6 = vmul.f32 7.401487e-17, %v1379_v13  ;;  %v507_v58 = vmul.f32 7.401487e-17, %v1384_v26 }
 0x2f4   :  { %1006 = vmatmul.mubr.msk.f32.gmra.mrb[14].mxu1 %vm80_vm0, %v1219_v10  ;;  %v228_v10 = vmul.f32 -1.110223e-16, %v1267_v39  ;;  %v363_v39 = vmul.f32 3.7007433e-16, %v1317_v3 }
 0x2f5   :  { %v376_v37 = vadd.f32 %v368_v48, %v239_v61  ;;  %v511_v19 = vadd.f32 %v503_v42, %v374_v33  ;;  %v512_v40 = vadd.f32 %v504_v6, %v375_v46 }
 0x2f6   :  { %v236_v49 = vadd.f32 %v228_v10, %v74_v7  ;;  %v371_v23 = vadd.f32 %v363_v39, %v234_v32  ;;  %v505_v7 = vmul.f32 7.401487e-17, %v1376_v12 }
 0x2f8   :  { %v373_v34 = vadd.f32 %v365_v43, %v236_v49  ;;  %v508_v2 = vadd.f32 %v500_v18, %v371_v23  ;;  %v513_v39 = vadd.f32 %v505_v7, %v376_v37 }
 0x2fa   :  { %v510_v13 = vadd.f32 %v502_v0, %v373_v34 }
 0x3bb   :  { %v998_v62 = vpop.f32.mrb[8].mxu1 }
 0x3bc   :  { %v622_v11 = vmul.f32 2.0, %v998_v62  ;;  %v582_v17 = vpop.f32.mrb[9].mxu1 }
 0x3bd   :  { %v621_v20 = vmul.f32 2.0, %v582_v17 }
 0x3be   :  { %v630_v31 = vsub.f32 %v622_v11, %v1314_v63 }
 0x3bf   :  { %v629_v44 = vsub.f32 %v621_v20, %v1317_v3  ;;  %v1001_v45 = vpop.f32.mrb[10].mxu1  ;;  %v378_v20 = vadd.f32 %v370_v41, %v1435_v57 }
 0x3c0   :  { %v638_v53 = vmul.f32 4.8109666e-16, %v630_v31  ;;  %v624_v50 = vmul.f32 2.0, %v1001_v45  ;;  %v592_v54 = vpop.f32.mrb[11].mxu1  ;;  %v377_v31 = vadd.f32 %v369_v51, %v1437_v5 }
 0x3c1   :  { %v637_v63 = vmul.f32 4.8109666e-16, %v629_v44  ;;  %v623_v4 = vmul.f32 2.0, %v592_v54  ;;  %v515_v37 = vadd.f32 %v507_v58, %v378_v20 }
 0x3c2   :  { %v632_v59 = vsub.f32 %v624_v50, %v1322_v14  ;;  %v646_v3 = vadd.f32 %v638_v53, %v509_v1  ;;  %v514_v45 = vadd.f32 %v506_v8, %v377_v31 }
 0x3c3   :  { %v631_v10 = vsub.f32 %v623_v4, %v1325_v16  ;;  %v1004_v9 = vpop.f32.mrb[12].mxu1  ;;  %v645_v27 = vadd.f32 %v637_v63, %v508_v2 }
 0x3c4   :  { %v640_v22 = vmul.f32 4.8109666e-16, %v632_v59  ;;  %v626_v28 = vmul.f32 2.0, %v1004_v9  ;;  %v602_v29 = vpop.f32.mrb[13].mxu1  ;;  %v697_v60 = vsel %vm80_vm0, %v646_v3, 0.0  ;;  %v825_v38 = vpack.c.bf16 %v646_v3, %v646_v3 }
 0x3c5   :  { %v639_v55 = vmul.f32 4.8109666e-16, %v631_v10  ;;  %v625_v32 = vmul.f32 2.0, %v602_v29  ;;  %698 = vadd.xlane.f32.xlu0 %v697_v60  ;;  %v824_v12 = vpack.c.bf16 %v645_v27, %v645_v27  ;;  %v694_v48 = vsel %vm80_vm0, %v645_v27, 0.0 }
 0x3c6   :  { %v634_v14 = vsub.f32 %v626_v28, %v1330_v24  ;;  %687 = vst.msk [vmem:[#allocation5 + $0x4] sm:$0xf] %vm685_vm9, %v825_v38  ;;  %v648_v16 = vadd.f32 %v640_v22, %v511_v19 }
 0x3c7   :  { %v633_v47 = vsub.f32 %v625_v32, %v1333_v25  ;;  %v1007_v43 = vpop.f32.mrb[14].mxu1  ;;  %686 = vst.msk [vmem:[#allocation5] sm:$0xf] %vm685_vm9, %v824_v12  ;;  %v647_v49 = vadd.f32 %v639_v55, %v510_v13 }
 0x3c8   :  { %v642_v61 = vmul.f32 4.8109666e-16, %v634_v14  ;;  %v628_v56 = vmul.f32 2.0, %v1007_v43  ;;  %v612_v52 = vpop.f32.mrb[15].mxu1  ;;  %v703_v24 = vsel %vm80_vm0, %v648_v16, 0.0  ;;  %v827_v62 = vpack.c.bf16 %v648_v16, %v648_v16 }
 0x3c9   :  { %v641_v11 = vmul.f32 4.8109666e-16, %v633_v47  ;;  %v627_v17 = vmul.f32 2.0, %v612_v52  ;;  %704 = vadd.xlane.f32.xlu1 %v703_v24  ;;  %695 = vadd.xlane.f32.xlu0 %v694_v48  ;;  %v826_v26 = vpack.c.bf16 %v647_v49, %v647_v49  ;;  %v700_v33 = vsel %vm80_vm0, %v647_v49, 0.0 }
 0x3ca   :  { %v636_v25 = vsub.f32 %v628_v56, %v1338_v35  ;;  %689 = vst.msk [vmem:[#allocation5 + $0xc] sm:$0xf] %vm685_vm9, %v827_v62  ;;  %v650_v18 = vadd.f32 %v642_v61, %v513_v39 }
 0x3cb   :  { %v635_v21 = vsub.f32 %v627_v17, %v1341_v36  ;;  %688 = vst.msk [vmem:[#allocation5 + $0x8] sm:$0xf] %vm685_vm9, %v826_v26  ;;  %v649_v23 = vadd.f32 %v641_v11, %v512_v40 }
 0x3cc   :  { %v644_v30 = vmul.f32 4.8109666e-16, %v636_v25  ;;  %v829_v34 = vpack.c.bf16 %v650_v18, %v650_v18  ;;  %v709_v5 = vsel %vm80_vm0, %v650_v18, 0.0 }
 0x3cd   :  { %v643_v42 = vmul.f32 4.8109666e-16, %v635_v21  ;;  %701 = vadd.xlane.f32.xlu1 %v700_v33  ;;  %v828_v35 = vpack.c.bf16 %v649_v23, %v649_v23  ;;  %v706_v44 = vsel %vm80_vm0, %v649_v23, 0.0 }
 0x3ce   :  { %707 = vadd.xlane.f32.xlu0 %v706_v44  ;;  %691 = vst.msk [vmem:[#allocation5 + $0x14] sm:$0xf] %vm685_vm9, %v829_v34  ;;  %v652_v36 = vadd.f32 %v644_v30, %v515_v37 }
 0x3cf   :  { %690 = vst.msk [vmem:[#allocation5 + $0x10] sm:$0xf] %vm685_vm9, %v828_v35  ;;  %v651_v57 = vadd.f32 %v643_v42, %v514_v45 }
 0x3d0   :  { %v831_v41 = vpack.c.bf16 %v652_v36, %v652_v36  ;;  %v715_v53 = vsel %vm80_vm0, %v652_v36, 0.0 }
 0x3d1   :  { %710 = vadd.xlane.f32.xlu1 %v709_v5  ;;  %v830_v46 = vpack.c.bf16 %v651_v57, %v651_v57  ;;  %v712_v51 = vsel %vm80_vm0, %v651_v57, 0.0 }
 0x3d2   :  { %713 = vadd.xlane.f32.xlu0 %v712_v51  ;;  %693 = vst.msk [vmem:[#allocation5 + $0x1c] sm:$0xf] %vm685_vm9, %v831_v41 }
 0x3d3   :  { %692 = vst.msk [vmem:[#allocation5 + $0x18] sm:$0xf] %vm685_vm9, %v830_v46 }
 0x3d5   :  { %716 = vadd.xlane.f32.xlu1 %v715_v53 }
 0x3d6   :  { %1113 = shalt.err (!%p1110_p12)
}
 0x3d7   :  { %s1114_s30 = scalar_lea.hbm %s1524_s2, 512 }
 0x3d8   :  { %p1115_p13 = scmp.ne.s32.totalorder %s1524_s2, %s1114_s30  ;;  %p1118_p0 = scmp.lt.u32.totalorder %s1114_s30, %s1524_s2 }
 0x3da   :  { %p1120_p1 = pnand %p1118_p0, %p1115_p13 }
 0x3dc   :  { %1123 = shalt.err (!%p1120_p1)
}
 0x3dd   :  { %s1157_s8 = smov 64   ;;  %s1158_s9 = smov 4   ;;  %v823_v50 = vld [vmem:[%s1523_s1] ss:$0 sm:$0xff]  ;;  %vm733_vm10 = vcmp.lt.s32.totalorder %v1239_v15, 8 }
 0x3de   :  { %761 = dma.vmem_to_hbm [thread:$0]  %s756_s26, 512, %s1524_s2, [#allocation4], %s1157_s8, %s1157_s8, %s1158_s9  }
 0x3df   :  { %s1159_s1 = smov [#allocation6]  }
 0x3e0   :  { %s767_s2 = sshll.u32 %s1159_s1, 4  ;;  %s768_s2 = int_to_ptr.vmem [resolvable:$true] %s767_s2 }
 0x3e1   :  { %s1124_s14 = scalar_lea.vmem %s768_s2, 1024  ;;  %p1129_p3 = scmp.lt.s32.totalorder %s768_s2, %s768_s2 }
 0x3e2   :  { %p1125_p2 = scmp.ne.s32.totalorder %s768_s2, %s1124_s14  ;;  %p1130_p4 = scmp.lt.s32.totalorder %s1124_s14, %s1124_s14 }
 0x3e4   :  { %p1131_p5 = por %p1130_p4, %p1129_p3 }
 0x3e6   :  { %p1132_p6 = pnand %p1131_p5, %p1125_p2 }
 0x452   :  { %v699_v54 = vpop.xlane.xlu0 %698 }
 0x453   :  { %v726_v1 = vmul.f32 %v823_v50, %v699_v54 }
 0x455   :  { %v735_v0 = vsel %vm733_vm10, %v726_v1, -1e+30 }
 0x456   :  { %743 = vst [vmem:[#allocation6 + $0x8] sm:$0xff] %v735_v0  ;;  %v705_v63 = vpop.xlane.xlu1 %704  ;;  %v696_v4 = vpop.xlane.xlu0 %695 }
 0x457   :  { %v728_v2 = vmul.f32 %v823_v50, %v705_v63  ;;  %v725_v7 = vmul.f32 %v823_v50, %v696_v4 }
 0x459   :  { %v737_v6 = vsel %vm733_vm10, %v728_v2, -1e+30  ;;  %v734_v59 = vsel %vm733_vm10, %v725_v7, -1e+30 }
 0x45a   :  { %745 = vst [vmem:[#allocation6 + $0x18] sm:$0xff] %v737_v6  ;;  %742 = vst [vmem:[#allocation6] sm:$0xff] %v734_v59  ;;  %v702_v3 = vpop.xlane.xlu1 %701 }
 0x45b   :  { %v727_v10 = vmul.f32 %v823_v50, %v702_v3  ;;  %v708_v9 = vpop.xlane.xlu0 %707 }
 0x45c   :  { %v729_v19 = vmul.f32 %v823_v50, %v708_v9 }
 0x45d   :  { %v736_v27 = vsel %vm733_vm10, %v727_v10, -1e+30 }
 0x45e   :  { %744 = vst [vmem:[#allocation6 + $0x10] sm:$0xff] %v736_v27  ;;  %v738_v22 = vsel %vm733_vm10, %v729_v19, -1e+30  ;;  %v711_v28 = vpop.xlane.xlu1 %710 }
 0x45f   :  { %746 = vst [vmem:[#allocation6 + $0x20] sm:$0xff] %v738_v22  ;;  %v730_v29 = vmul.f32 %v823_v50, %v711_v28  ;;  %v714_v60 = vpop.xlane.xlu0 %713 }
 0x460   :  { %v731_v38 = vmul.f32 %v823_v50, %v714_v60 }
 0x461   :  { %v739_v55 = vsel %vm733_vm10, %v730_v29, -1e+30 }
 0x462   :  { %747 = vst [vmem:[#allocation6 + $0x28] sm:$0xff] %v739_v55  ;;  %v740_v32 = vsel %vm733_vm10, %v731_v38, -1e+30  ;;  %v717_v12 = vpop.xlane.xlu1 %716 }
 0x463   :  { %748 = vst [vmem:[#allocation6 + $0x30] sm:$0xff] %v740_v32  ;;  %v732_v13 = vmul.f32 %v823_v50, %v717_v12 }
 0x465   :  { %v741_v14 = vsel %vm733_vm10, %v732_v13, -1e+30 }
 0x466   :  { %749 = vst [vmem:[#allocation6 + $0x38] sm:$0xff] %v741_v14 }
 0x467   :  { %1135 = shalt.err (!%p1132_p6)
}
 0x468   :  { %s1136_s17 = scalar_lea.hbm %s1525_s3, 1024 }
 0x469   :  { %p1137_p7 = scmp.ne.s32.totalorder %s1525_s3, %s1136_s17  ;;  %p1140_p8 = scmp.lt.u32.totalorder %s1136_s17, %s1525_s3 }
 0x46b   :  { %p1142_p9 = pnand %p1140_p8, %p1137_p7 }
 0x46d   :  { %1145 = shalt.err (!%p1142_p9)
}
 0x46e   :  { %773 = dma.vmem_to_hbm [thread:$0]  %s768_s2, 1024, %s1525_s3, [#allocation7], %s1153_s22, %s1153_s22, %s1154_s23  }
 0x46f   :  { %1148 = dma.done.wait [#allocation4], 512  }
 0x470   :  { %1149 = vsyncadd [#allocation4], 4294966784 }
 0x471   :  { %1150 = dma.done.wait [#allocation7], 1024  }
 0x472   :  { %1151 = vsyncadd [#allocation7], 4294966272 }
 0x473   :  { %780 = vsyncpa [#allocation3], 1 }
 0x474   :  { %781 = vsyncpa [#allocation4], 1 }
 0x475   :  { %782 = vsyncpa [#allocation7], 1 }

</bundles_post_ra>
